<compile_context>
chip_gen: v5e
topology: v5e:2x2
jax: 0.10.0
libtpu: 0.0.40
codegen_flags: <defaults>
</compile_context>

<pallas_src>
import functools

import jax
import jax.numpy as jnp
from jax.experimental import pallas as pl
from jax.experimental.pallas import tpu as pltpu


def _round_up(v, m):
    return ((v + m - 1) // m) * m


def _fused_mlp_kernel(x_ref, *refs, num_layers: int):
    """refs = (w0, b0, w1, b1, ..., w_{L-1}, b_{L-1}, o_ref).

    x_ref:  (TM, Din_p)   compute dtype (bf16)
    w_l:    (din_p, dout_p) compute dtype (bf16)
    b_l:    (1, dout_p)   float32
    o_ref:  (TM, Dout_p)  output dtype (f32)
    """
    o_ref = refs[-1]
    wb = refs[:-1]
    h = x_ref[...]
    for l in range(num_layers):
        w = wb[2 * l][...]
        b = wb[2 * l + 1][...]
        # MXU matmul with f32 accumulation, bias + activation on the VPU.
        y = jnp.dot(h, w, preferred_element_type=jnp.float32)
        y = y + b
        if l != num_layers - 1:
            y = jnp.maximum(y, 0.0)        # BasicBlock's ReLU
            h = y.astype(w.dtype)          # back to bf16 for the next MXU pass
        else:
            h = y                          # final nn.Linear: no activation
    o_ref[...] = h.astype(o_ref.dtype)


def mlp_forward(x, params, *, tile_m=512, compute_dtype=jnp.bfloat16):
    """Fused MLP forward. x: [N, Din]; params: list of (w [Din,Dout], b [Dout])."""
    n, din = x.shape
    num_layers = len(params)
    out_dtype = x.dtype
    dout_true = params[-1][0].shape[1]
    cd_bytes = jnp.dtype(compute_dtype).itemsize

    # Lane-dense (multiple-of-128) padded layer dims.
    layer_dims = [(w.shape[0], w.shape[1]) for (w, _) in params]
    padded_dims = [(_round_up(di, 128), _round_up(do, 128)) for di, do in layer_dims]
    din_p = padded_dims[0][0]
    dout_p = padded_dims[-1][1]
    max_d = max(max(d) for d in padded_dims)

    # Batch tile: multiple of 16 (bf16 sublane packing). Shrink until the VMEM
    # working set (double-buffered inputs/outputs + resident weights + live
    # activations) fits a conservative budget that is safe on v7x (64 MiB).
    w_bytes = sum(di * do * cd_bytes + do * 4 for di, do in padded_dims)
    budget = 40 << 20
    tm = min(int(tile_m), _round_up(n, 16))
    tm = max(16, _round_up(tm, 16))

    def _vmem_estimate(tm_):
        tile_io = tm_ * din_p * cd_bytes + tm_ * dout_p * 4
        act = 2 * tm_ * max_d * 4
        return 2 * (w_bytes + tile_io) + act

    while _vmem_estimate(tm) > budget and tm > 16:
        tm = max(16, _round_up(tm // 2, 16))
    n_p = _round_up(n, tm)
    grid = (n_p // tm,)

    # Zero-pad & cast operands (zero padding does not change the math; padded
    # output rows/cols are sliced off below).
    x_p = jnp.pad(x, ((0, n_p - n), (0, din_p - din))).astype(compute_dtype)
    flat_wb = []
    for (w, b), (dip, dop) in zip(params, padded_dims):
        w_p = jnp.pad(w, ((0, dip - w.shape[0]), (0, dop - w.shape[1])))
        b_p = jnp.pad(b, (0, dop - b.shape[0])).reshape(1, dop)
        flat_wb.append(w_p.astype(compute_dtype))
        flat_wb.append(b_p.astype(jnp.float32))

    in_specs = [pl.BlockSpec((tm, din_p), lambda i: (i, 0))]
    for arr in flat_wb:
        in_specs.append(pl.BlockSpec(arr.shape, lambda i: (0, 0)))

    flops = sum(2 * n_p * di * do for di, do in padded_dims)
    bytes_accessed = x_p.size * cd_bytes + w_bytes + n_p * dout_p * 4
    vmem_limit = int(min(48 << 20, max(_vmem_estimate(tm) + (8 << 20), 16 << 20)))

    kernel = functools.partial(_fused_mlp_kernel, num_layers=num_layers)
    out_p = pl.pallas_call(
        kernel,
        out_shape=jax.ShapeDtypeStruct((n_p, dout_p), out_dtype),
        grid=grid,
        in_specs=in_specs,
        out_specs=pl.BlockSpec((tm, dout_p), lambda i: (i, 0)),
        compiler_params=pltpu.CompilerParams(
            dimension_semantics=("parallel",),
            vmem_limit_bytes=vmem_limit,
        ),
        cost_estimate=pl.CostEstimate(
            flops=flops, transcendentals=0, bytes_accessed=bytes_accessed),
    )(x_p, *flat_wb)
    return out_p[:n, :dout_true]


def init_mlp_params(key, dim_in, dim_out, dim_hidden, num_layers):
    """Deterministic init matching PyTorch nn.Linear bounds (U(-1/sqrt(fan_in), +))."""
    params = []
    dims = []
    for l in range(num_layers):
        if l == 0:
            dims.append((dim_in, dim_hidden))
        elif l != num_layers - 1:
            dims.append((dim_hidden, dim_hidden))
        else:
            dims.append((dim_hidden, dim_out))
    for di, do in dims:
        kw, kb, key = jax.random.split(key, 3)
        bound = 1.0 / jnp.sqrt(di)
        w = jax.random.uniform(kw, (di, do), jnp.float32, -bound, bound)
        b = jax.random.uniform(kb, (do,), jnp.float32, -bound, bound)
        params.append((w, b))
    return params


def mlp_reference(x, params):
    """Pure-f32 reference (matches the PyTorch module numerics)."""
    num_layers = len(params)
    for l, (w, b) in enumerate(params):
        x = x @ w + b
        if l != num_layers - 1:
            x = jnp.maximum(x, 0.0)
    return x


def mlp_reference_matched(x, params, compute_dtype=jnp.bfloat16):
    """Reference using the same bf16-matmul / f32-accumulate recipe as the kernel."""
    num_layers = len(params)
    h = x.astype(compute_dtype)
    for l, (w, b) in enumerate(params):
        y = jnp.dot(h, w.astype(compute_dtype),
                    preferred_element_type=jnp.float32) + b
        if l != num_layers - 1:
            y = jnp.maximum(y, 0.0)
            h = y.astype(compute_dtype)
        else:
            h = y
    return h


if __name__ == "__main__":
    key = jax.random.PRNGKey(0)
    kx, kp = jax.random.split(key)

    # Small shapes consistent with the module: MLP(dim_in=32, dim_out=16,
    # dim_hidden=64, num_layers=3) applied to a batch of 8 vectors.
    batch, dim_in, dim_hidden, dim_out, num_layers = 8, 32, 64, 16, 3

    x = jax.random.normal(kx, (batch, dim_in), jnp.float32)
    params = init_mlp_params(kp, dim_in, dim_out, dim_hidden, num_layers)

    fwd = jax.jit(mlp_forward)
    out = fwd(x, params)
    out = jax.block_until_ready(out)

    assert out.shape == (batch, dim_out), out.shape
    # Tight check against a reference that uses the same bf16/f32 recipe.
    ref_matched = mlp_reference_matched(x, params)
    assert jnp.allclose(out, ref_matched, atol=1e-4, rtol=1e-4), "mismatch vs matched ref"
    # Loose check against the full-f32 PyTorch-equivalent reference (bf16 matmuls).
    ref_f32 = mlp_reference(x, params)
    assert jnp.allclose(out, ref_f32, atol=5e-2, rtol=5e-2), "mismatch vs f32 reference"

    print("KERNEL_OK")
</pallas_src>

<mosaic_0001>
module attributes {stable_mosaic.version = 11 : i64} {
  func.func @_fused_mlp_kernel(%arg0: i32, %arg1: memref<16x128xbf16, #tpu.memory_space<vmem>>, %arg2: memref<128x128xbf16, #tpu.memory_space<vmem>>, %arg3: memref<1x128xf32, #tpu.memory_space<vmem>>, %arg4: memref<128x128xbf16, #tpu.memory_space<vmem>>, %arg5: memref<1x128xf32, #tpu.memory_space<vmem>>, %arg6: memref<128x128xbf16, #tpu.memory_space<vmem>>, %arg7: memref<1x128xf32, #tpu.memory_space<vmem>>, %arg8: memref<16x128xf32, #tpu.memory_space<vmem>>) attributes {dimension_semantics = [#tpu.dimension_semantics<parallel>], iteration_bounds = array<i64: 1>, scalar_prefetch = 0 : i64, scratch_operands = 0 : i64, tpu.core_type = #tpu.core_type<tc>, window_params = [{transform_indices = @transform_0, window_bounds = array<i64: 16, 128>}, {pipeline_mode = #tpu.pipeline_mode<synchronous>, transform_indices = @transform_1, window_bounds = array<i64: 128, 128>}, {pipeline_mode = #tpu.pipeline_mode<synchronous>, transform_indices = @transform_2, window_bounds = array<i64: 1, 128>}, {pipeline_mode = #tpu.pipeline_mode<synchronous>, transform_indices = @transform_3, window_bounds = array<i64: 128, 128>}, {pipeline_mode = #tpu.pipeline_mode<synchronous>, transform_indices = @transform_4, window_bounds = array<i64: 1, 128>}, {pipeline_mode = #tpu.pipeline_mode<synchronous>, transform_indices = @transform_5, window_bounds = array<i64: 128, 128>}, {pipeline_mode = #tpu.pipeline_mode<synchronous>, transform_indices = @transform_6, window_bounds = array<i64: 1, 128>}, {transform_indices = @transform_7, window_bounds = array<i64: 16, 128>}]} {
    %c0 = arith.constant 0 : index
    %c0_0 = arith.constant 0 : index
    %0 = vector.load %arg1[%c0, %c0_0] : memref<16x128xbf16, #tpu.memory_space<vmem>>, vector<16x128xbf16>
    %c0_1 = arith.constant 0 : index
    %c0_2 = arith.constant 0 : index
    %1 = vector.load %arg2[%c0_1, %c0_2] : memref<128x128xbf16, #tpu.memory_space<vmem>>, vector<128x128xbf16>
    %c0_3 = arith.constant 0 : index
    %c0_4 = arith.constant 0 : index
    %2 = vector.load %arg3[%c0_3, %c0_4] : memref<1x128xf32, #tpu.memory_space<vmem>>, vector<1x128xf32>
    %cst = arith.constant dense<0.000000e+00> : vector<16x128xf32>
    %3 = tpu.matmul %0, %1, %cst {dimension_numbers = #tpu.dot_dimension_numbers<[1], [0], [0], [1], [0, 0, 1, 1], [], []>} : vector<16x128xbf16>, vector<128x128xbf16>, vector<16x128xf32> -> vector<16x128xf32>
    %4 = vector.broadcast %2 : vector<1x128xf32> to vector<16x128xf32>
    %5 = arith.addf %3, %4 : vector<16x128xf32>
    %cst_5 = arith.constant 0.000000e+00 : f32
    %6 = vector.broadcast %cst_5 : f32 to vector<16x128xf32>
    %7 = arith.maximumf %5, %6 : vector<16x128xf32>
    %8 = arith.truncf %7 : vector<16x128xf32> to vector<16x128xbf16>
    %c0_6 = arith.constant 0 : index
    %c0_7 = arith.constant 0 : index
    %9 = vector.load %arg4[%c0_6, %c0_7] : memref<128x128xbf16, #tpu.memory_space<vmem>>, vector<128x128xbf16>
    %c0_8 = arith.constant 0 : index
    %c0_9 = arith.constant 0 : index
    %10 = vector.load %arg5[%c0_8, %c0_9] : memref<1x128xf32, #tpu.memory_space<vmem>>, vector<1x128xf32>
    %cst_10 = arith.constant dense<0.000000e+00> : vector<16x128xf32>
    %11 = tpu.matmul %8, %9, %cst_10 {dimension_numbers = #tpu.dot_dimension_numbers<[1], [0], [0], [1], [0, 0, 1, 1], [], []>} : vector<16x128xbf16>, vector<128x128xbf16>, vector<16x128xf32> -> vector<16x128xf32>
    %12 = vector.broadcast %10 : vector<1x128xf32> to vector<16x128xf32>
    %13 = arith.addf %11, %12 : vector<16x128xf32>
    %cst_11 = arith.constant 0.000000e+00 : f32
    %14 = vector.broadcast %cst_11 : f32 to vector<16x128xf32>
    %15 = arith.maximumf %13, %14 : vector<16x128xf32>
    %16 = arith.truncf %15 : vector<16x128xf32> to vector<16x128xbf16>
    %c0_12 = arith.constant 0 : index
    %c0_13 = arith.constant 0 : index
    %17 = vector.load %arg6[%c0_12, %c0_13] : memref<128x128xbf16, #tpu.memory_space<vmem>>, vector<128x128xbf16>
    %c0_14 = arith.constant 0 : index
    %c0_15 = arith.constant 0 : index
    %18 = vector.load %arg7[%c0_14, %c0_15] : memref<1x128xf32, #tpu.memory_space<vmem>>, vector<1x128xf32>
    %cst_16 = arith.constant dense<0.000000e+00> : vector<16x128xf32>
    %19 = tpu.matmul %16, %17, %cst_16 {dimension_numbers = #tpu.dot_dimension_numbers<[1], [0], [0], [1], [0, 0, 1, 1], [], []>} : vector<16x128xbf16>, vector<128x128xbf16>, vector<16x128xf32> -> vector<16x128xf32>
    %20 = vector.broadcast %18 : vector<1x128xf32> to vector<16x128xf32>
    %21 = arith.addf %19, %20 : vector<16x128xf32>
    %c0_17 = arith.constant 0 : index
    %c0_18 = arith.constant 0 : index
    %22 = vector.load %arg8[%c0_17, %c0_18] : memref<16x128xf32, #tpu.memory_space<vmem>>, vector<16x128xf32>
    tpu.vector_store %arg8[%c0_17, %c0_18], %21 {strides = array<i32>} : memref<16x128xf32, #tpu.memory_space<vmem>>, vector<16x128xf32>,
    return
  }
  func.func @transform_0(%arg0: i32) -> (i32, i32) {
    %c0_i32 = arith.constant 0 : i32
    %c0_i32_0 = arith.constant 0 : i32
    return %arg0, %c0_i32 : i32, i32
  }
  func.func @transform_1(%arg0: i32) -> (i32, i32) {
    %c0_i32 = arith.constant 0 : i32
    %c0_i32_0 = arith.constant 0 : i32
    %c0_i32_1 = arith.constant 0 : i32
    return %c0_i32, %c0_i32_0 : i32, i32
  }
  func.func @transform_2(%arg0: i32) -> (i32, i32) {
    %c0_i32 = arith.constant 0 : i32
    %c0_i32_0 = arith.constant 0 : i32
    %c0_i32_1 = arith.constant 0 : i32
    return %c0_i32, %c0_i32_0 : i32, i32
  }
  func.func @transform_3(%arg0: i32) -> (i32, i32) {
    %c0_i32 = arith.constant 0 : i32
    %c0_i32_0 = arith.constant 0 : i32
    %c0_i32_1 = arith.constant 0 : i32
    return %c0_i32, %c0_i32_0 : i32, i32
  }
  func.func @transform_4(%arg0: i32) -> (i32, i32) {
    %c0_i32 = arith.constant 0 : i32
    %c0_i32_0 = arith.constant 0 : i32
    %c0_i32_1 = arith.constant 0 : i32
    return %c0_i32, %c0_i32_0 : i32, i32
  }
  func.func @transform_5(%arg0: i32) -> (i32, i32) {
    %c0_i32 = arith.constant 0 : i32
    %c0_i32_0 = arith.constant 0 : i32
    %c0_i32_1 = arith.constant 0 : i32
    return %c0_i32, %c0_i32_0 : i32, i32
  }
  func.func @transform_6(%arg0: i32) -> (i32, i32) {
    %c0_i32 = arith.constant 0 : i32
    %c0_i32_0 = arith.constant 0 : i32
    %c0_i32_1 = arith.constant 0 : i32
    return %c0_i32, %c0_i32_0 : i32, i32
  }
  func.func @transform_7(%arg0: i32) -> (i32, i32) {
    %c0_i32 = arith.constant 0 : i32
    %c0_i32_0 = arith.constant 0 : i32
    return %arg0, %c0_i32 : i32, i32
  }
}

</mosaic_0001>

<bundles_post_ra>
// kernel: mlp_forward.1
= control target key start
LH: loop header
LB: loop body
LE: loop exit
PB: predicated region body
PF: predicated region fallthrough
CT: control target
= control target key end

     0   :  { %s550_s1 = inlined_call_operand.vmem [shape: bf16[128,128], index: 1, kind: input, shape index: {}]   ;;  %s551_s3 = inlined_call_operand.vmem [shape: bf16[128,128], index: 3, kind: input, shape index: {}]   ;;  %s552_s2 = inlined_call_operand.vmem [shape: f32[1,128], index: 2, kind: input, shape index: {}]   ;;  %s553_s0 = inlined_call_operand.vmem [shape: bf16[16,128], index: 0, kind: input, shape index: {}]   ;;  %s554_s4 = inlined_call_operand.vmem [shape: f32[1,128], index: 4, kind: input, shape index: {}]   ;;  %s555_s5 = inlined_call_operand.vmem [shape: bf16[128,128], index: 5, kind: input, shape index: {}]   ;;  %s556_s6 = inlined_call_operand.vmem [shape: f32[1,128], index: 6, kind: input, shape index: {}]   ;;  %s557_s7 = inlined_call_operand.vmem [shape: f32[16,128], index: 7, kind: output, shape index: {}]  }
   0x1   :  { %v400_v0 = vld [vmem:[%s550_s1 + $0x38] sm:$0xff]  ;;  %v399_v1 = vld [vmem:[%s550_s1 + $0x30] sm:$0xff]  ;;  %v398_v4 = vld [vmem:[%s550_s1 + $0x28] sm:$0xff] }
   0x2   :  { %102 = vmatpush.bf16.msra.mxu0 %v400_v0  ;;  %v408_v2 = vld [vmem:[%s551_s3 + $0x38] sm:$0xff]  ;;  %v407_v3 = vld [vmem:[%s551_s3 + $0x30] sm:$0xff]  ;;  %v406_v5 = vld [vmem:[%s551_s3 + $0x28] sm:$0xff] }
   0x3   :  { %187 = vmatpush.bf16.msra.mxu1 %v408_v2  ;;  %v397_v6 = vld [vmem:[%s550_s1 + $0x20] sm:$0xff]  ;;  %v396_v8 = vld [vmem:[%s550_s1 + $0x18] sm:$0xff]  ;;  %v395_v9 = vld [vmem:[%s550_s1 + $0x10] sm:$0xff] }
   0x4   :  { %v405_v7 = vld [vmem:[%s551_s3 + $0x20] sm:$0xff]  ;;  %v394_v10 = vld [vmem:[%s550_s1 + $0x8] sm:$0xff]  ;;  %v404_v13 = vld [vmem:[%s551_s3 + $0x18] sm:$0xff] }
   0x5   :  { %v393_v11 = vld [vmem:[%s550_s1] sm:$0xff]  ;;  %v403_v14 = vld [vmem:[%s551_s3 + $0x10] sm:$0xff]  ;;  %v402_v15 = vld [vmem:[%s551_s3 + $0x8] sm:$0xff] }
   0x6   :  { %103 = vmatpush.bf16.msra.mxu0 %v399_v1  ;;  %v392_v12 = vld [vmem:[%s553_s0] sm:$0xff]  ;;  %v416_v17 = vld [vmem:[%s555_s5 + $0x38] sm:$0xff]  ;;  %v415_v18 = vld [vmem:[%s555_s5 + $0x30] sm:$0xff] }
   0x7   :  { %188 = vmatpush.bf16.msra.mxu1 %v407_v3  ;;  %v401_v16 = vld [vmem:[%s551_s3] sm:$0xff]  ;;  %272 = vmatpush.bf16.msra.mxu2 %v416_v17  ;;  %v414_v19 = vld [vmem:[%s555_s5 + $0x28] sm:$0xff]  ;;  %v412_v29 = vld [vmem:[%s555_s5 + $0x18] sm:$0xff] }
   0x8   :  { %v413_v20 = vld [vmem:[%s555_s5 + $0x20] sm:$0xff]  ;;  %v411_v30 = vld [vmem:[%s555_s5 + $0x10] sm:$0xff]  ;;  %v410_v31 = vld [vmem:[%s555_s5 + $0x8] sm:$0xff] }
   0x9   :  { %v417_v22 = vld [vmem:[%s552_s2] ss:$0 sm:$0xff] }
   0xa   :  { %104 = vmatpush.bf16.msra.mxu0 %v398_v4  ;;  %v409_v32 = vld [vmem:[%s555_s5] sm:$0xff] }
   0xb   :  { %189 = vmatpush.bf16.msra.mxu1 %v406_v5  ;;  %273 = vmatpush.bf16.msra.mxu2 %v415_v18  ;;  %v418_v34 = vld [vmem:[%s554_s4] ss:$0 sm:$0xff] }
   0xc   :  { %v419_v41 = vld [vmem:[%s556_s6] ss:$0 sm:$0xff] }
   0xe   :  { %105 = vmatpush.bf16.msra.mxu0 %v397_v6 }
   0xf   :  { %190 = vmatpush.bf16.msra.mxu1 %v405_v7  ;;  %274 = vmatpush.bf16.msra.mxu2 %v414_v19 }
  0x12   :  { %106 = vmatpush.bf16.msra.mxu0 %v396_v8 }
  0x13   :  { %191 = vmatpush.bf16.msra.mxu1 %v404_v13  ;;  %275 = vmatpush.bf16.msra.mxu2 %v413_v20 }
  0x16   :  { %107 = vmatpush.bf16.msra.mxu0 %v395_v9 }
  0x17   :  { %192 = vmatpush.bf16.msra.mxu1 %v403_v14  ;;  %276 = vmatpush.bf16.msra.mxu2 %v412_v29 }
  0x1a   :  { %108 = vmatpush.bf16.msra.mxu0 %v394_v10 }
  0x1b   :  { %193 = vmatpush.bf16.msra.mxu1 %v402_v15  ;;  %277 = vmatpush.bf16.msra.mxu2 %v411_v30 }
  0x1e   :  { %109 = vmatpush.bf16.msra.mxu0 %v393_v11 }
  0x1f   :  { %194 = vmatpush.bf16.msra.mxu1 %v401_v16  ;;  %278 = vmatpush.bf16.msra.mxu2 %v410_v31 }
  0x21   :  { %110 = vmatmul.bf16.vlgmr.msra.gmra.mxu0 %v392_v12 }
  0x23   :  { %279 = vmatpush.bf16.msra.mxu2 %v409_v32 }
  0x9e   :  { %v111_v21 = vpop.f32.mrf.mxu0 }
  0x9f   :  { %v112_v23 = vadd.f32 %v417_v22, %v111_v21 }
  0xa1   :  { %v116_v26 = vmax.f32 %v112_v23, 0.0 }
  0xa6   :  { %v113_v24 = vpop.f32.mrf.mxu0 }
  0xa7   :  { %v114_v25 = vadd.f32 %v417_v22, %v113_v24 }
  0xa9   :  { %v117_v27 = vmax.f32 %v114_v25, 0.0 }
  0xab   :  { %v118_v28 = vpack.c.bf16 %v117_v27, %v116_v26 }
  0xad   :  { %195 = vmatmul.bf16.vlgmr.msra.gmra.mxu1 %v118_v28 }
 0x12a   :  { %v196_v33 = vpop.f32.mrf.mxu1 }
 0x12b   :  { %v197_v35 = vadd.f32 %v418_v34, %v196_v33 }
 0x12d   :  { %v201_v38 = vmax.f32 %v197_v35, 0.0 }
 0x132   :  { %v198_v36 = vpop.f32.mrf.mxu1 }
 0x133   :  { %v199_v37 = vadd.f32 %v418_v34, %v198_v36 }
 0x135   :  { %v202_v39 = vmax.f32 %v199_v37, 0.0 }
 0x137   :  { %v203_v40 = vpack.c.bf16 %v202_v39, %v201_v38 }
 0x139   :  { %280 = vmatmul.bf16.vlgmr.msra.gmra.mxu2 %v203_v40 }
 0x1bc   :  { %v281_v42 = vpop.f32.mrf.mxu2 }
 0x1bd   :  { %v282_v43 = vadd.f32 %v419_v41, %v281_v42 }
 0x1bf   :  { %286 = vst [vmem:[%s557_s7] sm:$0xff] %v282_v43 }
 0x1c4   :  { %v283_v44 = vpop.f32.mrf.mxu2 }
 0x1c5   :  { %v284_v45 = vadd.f32 %v419_v41, %v283_v44 }
 0x1c7   :  { %287 = vst [vmem:[%s557_s7 + $0x8] sm:$0xff] %v284_v45 }

</bundles_post_ra>
